<compile_context>
chip_gen: v6e
topology: v6e:2x2x1
jax: 0.10.0
libtpu: 0.0.40
codegen_flags: <defaults>
</compile_context>

<pallas_src>
import jax
import jax.numpy as jnp
from jax.experimental import pallas as pl
from jax.experimental.pallas import tpu as pltpu


def _round_up(x, m):
    return ((x + m - 1) // m) * m


def _conv_pack_kernel(w_ref, b_ref, p_ref, o_ref):
    # w_ref: (C, K_pad) resident weights; b_ref: (C, 1) resident bias;
    # p_ref: (K_pad, tm) im2col patch tile;  o_ref: (C, tm) lane-dense output tile.
    o_ref[...] = (
        jnp.dot(w_ref[...], p_ref[...], preferred_element_type=jnp.float32)
        + b_ref[...]
    )


def enc_server2_forward(x, conv1_weight, conv1_bias, stride):
    """x: (B, 1, H, W) float32; conv1_weight: (C, kh, kw); conv1_bias: (C,).

    Returns: (B, C * windows_nb) float32 -- the packed per-channel conv vectors
    (plaintext equivalent of the CKKS packed result).
    """
    B, cin, H, W = x.shape
    assert cin == 1, "EncServer2 conv has in_channels == 1"
    C, kh, kw = conv1_weight.shape
    oh = (H - kh) // stride + 1
    ow = (W - kw) // stride + 1
    windows_nb = oh * ow
    K = kh * kw
    M = B * windows_nb

    # Vectorized im2col: (B, 1, H, W) -> (B, K, oh, ow); K is row-major over
    # (kh, kw), matching conv1_weight.reshape(C, kh*kw).
    patches = jax.lax.conv_general_dilated_patches(
        x.astype(jnp.float32),
        filter_shape=(kh, kw),
        window_strides=(stride, stride),
        padding="VALID",
        dimension_numbers=("NCHW", "OIHW", "NCHW"),
    )
    # (B, K, WN) -> (K, B*WN): M ordered batch-major, window minor.
    p_km = jnp.transpose(patches.reshape(B, K, windows_nb), (1, 0, 2)).reshape(K, M)

    # Alignment padding: K -> multiple of 8 (sublane), M -> multiple of tm (lane).
    K_pad = _round_up(K, 8)
    tm = 512 if M >= 512 else _round_up(M, 128)
    M_pad = _round_up(M, tm)
    p_km = jnp.pad(p_km, ((0, K_pad - K), (0, M_pad - M)))

    w_ck = jnp.pad(
        conv1_weight.reshape(C, K).astype(jnp.float32), ((0, 0), (0, K_pad - K))
    )                                                       # (C, K_pad)
    b_c1 = conv1_bias.reshape(C, 1).astype(jnp.float32)     # (C, 1)

    grid = (M_pad // tm,)
    out_cm = pl.pallas_call(
        _conv_pack_kernel,
        out_shape=jax.ShapeDtypeStruct((C, M_pad), jnp.float32),
        grid_spec=pltpu.PrefetchScalarGridSpec(
            num_scalar_prefetch=0,
            grid=grid,
            in_specs=[
                pl.BlockSpec((C, K_pad), lambda i: (0, 0)),   # resident weights
                pl.BlockSpec((C, 1), lambda i: (0, 0)),       # resident bias
                pl.BlockSpec((K_pad, tm), lambda i: (0, i)),  # patch tile (streams)
            ],
            out_specs=pl.BlockSpec((C, tm), lambda i: (0, i)),
        ),
        compiler_params=pltpu.CompilerParams(
            dimension_semantics=("parallel",),
        ),
        cost_estimate=pl.CostEstimate(
            flops=2 * M_pad * K_pad * C,
            transcendentals=0,
            bytes_accessed=4 * (M_pad * K_pad + K_pad * C + M_pad * C),
        ),
    )(w_ck, b_c1, p_km)

    # pack_vectors: channel-major concat per batch element.
    out = out_cm[:, :M].reshape(C, B, windows_nb)
    out = jnp.transpose(out, (1, 0, 2)).reshape(B, C * windows_nb)
    return out
    # TODO(synk): CKKS encryption / ts.CKKSVector.pack_vectors ciphertext packing
    # has no Pallas equivalent; implemented as the equivalent plaintext computation.


if __name__ == "__main__":
    key = jax.random.PRNGKey(0)
    k_x, k_w, k_b = jax.random.split(key, 3)

    # Small, MNIST-conv-like config: Conv2d(1, 4, kernel_size=7, stride=3)
    B, H, W = 2, 16, 16
    C, kh, kw, stride = 4, 7, 7, 3

    x = jax.random.normal(k_x, (B, 1, H, W), dtype=jnp.float32)
    conv1_weight = jax.random.normal(k_w, (C, kh, kw), dtype=jnp.float32) * 0.1
    conv1_bias = jax.random.normal(k_b, (C,), dtype=jnp.float32) * 0.1

    out = enc_server2_forward(x, conv1_weight, conv1_bias, stride)
    out = jax.block_until_ready(out)

    # Reference check against lax conv (same semantics, plain JAX).
    ref_conv = jax.lax.conv_general_dilated(
        x, conv1_weight.reshape(C, 1, kh, kw),
        window_strides=(stride, stride), padding="VALID",
        dimension_numbers=("NCHW", "OIHW", "NCHW"),
    ) + conv1_bias.reshape(1, C, 1, 1)
    ref = ref_conv.reshape(B, -1)  # (B, C*windows_nb), channel-major

    assert out.shape == ref.shape
    assert jnp.allclose(out, ref, atol=1e-4, rtol=1e-4)

    print("KERNEL_OK")
</pallas_src>

<mosaic_0001>
module attributes {stable_mosaic.version = 11 : i64} {
  func.func @_conv_pack_kernel(%arg0: i32, %arg1: memref<4x56xf32, #tpu.memory_space<vmem>>, %arg2: memref<4x1xf32, #tpu.memory_space<vmem>>, %arg3: memref<56x128xf32, #tpu.memory_space<vmem>>, %arg4: memref<4x128xf32, #tpu.memory_space<vmem>>) attributes {dimension_semantics = [#tpu.dimension_semantics<parallel>], iteration_bounds = array<i64: 1>, scalar_prefetch = 0 : i64, scratch_operands = 0 : i64, tpu.core_type = #tpu.core_type<tc>, window_params = [{pipeline_mode = #tpu.pipeline_mode<synchronous>, transform_indices = @transform_0, window_bounds = array<i64: 4, 56>}, {pipeline_mode = #tpu.pipeline_mode<synchronous>, transform_indices = @transform_1, window_bounds = array<i64: 4, 1>}, {transform_indices = @transform_2, window_bounds = array<i64: 56, 128>}, {transform_indices = @transform_3, window_bounds = array<i64: 4, 128>}]} {
    %c0 = arith.constant 0 : index
    %c0_0 = arith.constant 0 : index
    %0 = vector.load %arg1[%c0, %c0_0] : memref<4x56xf32, #tpu.memory_space<vmem>>, vector<4x56xf32>
    %c0_1 = arith.constant 0 : index
    %c0_2 = arith.constant 0 : index
    %1 = vector.load %arg3[%c0_1, %c0_2] : memref<56x128xf32, #tpu.memory_space<vmem>>, vector<56x128xf32>
    %cst = arith.constant dense<0.000000e+00> : vector<4x128xf32>
    %2 = tpu.matmul %0, %1, %cst {dimension_numbers = #tpu.dot_dimension_numbers<[1], [0], [0], [1], [0, 0, 1, 1], [], []>} : vector<4x56xf32>, vector<56x128xf32>, vector<4x128xf32> -> vector<4x128xf32>
    %c0_3 = arith.constant 0 : index
    %c0_4 = arith.constant 0 : index
    %3 = vector.load %arg2[%c0_3, %c0_4] : memref<4x1xf32, #tpu.memory_space<vmem>>, vector<4x1xf32>
    %4 = vector.broadcast %3 : vector<4x1xf32> to vector<4x128xf32>
    %5 = arith.addf %2, %4 : vector<4x128xf32>
    %c0_5 = arith.constant 0 : index
    %c0_6 = arith.constant 0 : index
    %6 = vector.load %arg4[%c0_5, %c0_6] : memref<4x128xf32, #tpu.memory_space<vmem>>, vector<4x128xf32>
    tpu.vector_store %arg4[%c0_5, %c0_6], %5 {strides = array<i32>} : memref<4x128xf32, #tpu.memory_space<vmem>>, vector<4x128xf32>,
    return
  }
  func.func @transform_0(%arg0: i32) -> (i32, i32) {
    %c0_i32 = arith.constant 0 : i32
    %c0_i32_0 = arith.constant 0 : i32
    %c0_i32_1 = arith.constant 0 : i32
    return %c0_i32, %c0_i32_0 : i32, i32
  }
  func.func @transform_1(%arg0: i32) -> (i32, i32) {
    %c0_i32 = arith.constant 0 : i32
    %c0_i32_0 = arith.constant 0 : i32
    %c0_i32_1 = arith.constant 0 : i32
    return %c0_i32, %c0_i32_0 : i32, i32
  }
  func.func @transform_2(%arg0: i32) -> (i32, i32) {
    %c0_i32 = arith.constant 0 : i32
    %c0_i32_0 = arith.constant 0 : i32
    return %c0_i32, %arg0 : i32, i32
  }
  func.func @transform_3(%arg0: i32) -> (i32, i32) {
    %c0_i32 = arith.constant 0 : i32
    %c0_i32_0 = arith.constant 0 : i32
    return %c0_i32, %arg0 : i32, i32
  }
}

</mosaic_0001>

<bundles_post_ra>
// kernel: tpu_custom_call.1
= control target key start
LH: loop header
LB: loop body
LE: loop exit
PB: predicated region body
PF: predicated region fallthrough
CT: control target
= control target key end

     0   :  { %8 = vsyncpa [#allocation3], 0  ;;  %s250_s0 = inlined_call_operand.vmem [shape: f32[4,56], index: 0, kind: input, shape index: {}]   ;;  %s251_s1 = inlined_call_operand.vmem [shape: f32[4,1], index: 1, kind: input, shape index: {}]   ;;  %s252_s2 = inlined_call_operand.hbm [shape: f32[56,128], index: 2, kind: input, shape index: {}]   ;;  %s253_s3 = inlined_call_operand.hbm [shape: f32[4,128], index: 3, kind: output, shape index: {}]  }
   0x1   :  { %9 = vsyncpa [#allocation4], 0  ;;  %s211_s12 = smov [#allocation2]  }
   0x2   :  { %s19_s13 = sshll.u32 %s211_s12, 4  ;;  %s20_s13 = int_to_ptr.vmem [resolvable:$true] %s19_s13 }
   0x3   :  { %s175_s14 = scalar_lea.vmem %s20_s13, 896  ;;  %p180_p1 = scmp.lt.s32.totalorder %s20_s13, %s20_s13 }
   0x4   :  { %p176_p0 = scmp.ne.s32.totalorder %s20_s13, %s175_s14  ;;  %p181_p2 = scmp.lt.s32.totalorder %s175_s14, %s175_s14 }
   0x6   :  { %p182_p3 = por %p181_p2, %p180_p1 }
   0x8   :  { %p183_p4 = pnand %p182_p3, %p176_p0 }
   0xa   :  { %186 = shalt.err (!%p183_p4)
}
   0xb   :  { %s212_s15 = smov 128   ;;  %s213_s16 = smov 8  }
   0xc   :  { %25 = dma.hbm_to_vmem [thread:$0]  %s252_s2, 896, %s20_s13, [#allocation3], %s212_s15, %s212_s15, %s213_s16  }
   0xd   :  { %207 = dma.done.wait [#allocation3], 896  }
   0xe   :  { %208 = vsyncadd [#allocation3], 4294966400  ;;  %v214_v0 = vmov 0.0   ;;  %vm215_vm0 = vmmov 0   ;;  %v216_v1 = vmov 0   ;;  %v36_v2 = vld [vmem:[#allocation2 + $0x30] sm:$0xff] }
   0xf   :  { %142 = vmatprep.subr.mxu0 %v214_v0  ;;  %156 = vmatprep.mubr.msk.f32.mxu0 %vm215_vm0, %v214_v0  ;;  %v35_v3 = vld [vmem:[#allocation2 + $0x28] sm:$0xff]  ;;  %v34_v4 = vld [vmem:[#allocation2 + $0x20] sm:$0xff]  ;;  %v33_v6 = vld [vmem:[#allocation2 + $0x18] sm:$0xff]  ;;  %vm43_vm1 = vcmask 457728  }
  0x10   :  { %166 = vset.pattern.permute.xlu0 %v216_v1  ;;  %143 = vmatpush3.msra.mxu0 %v36_v2  ;;  %v37_v5 = vld [vmem:[%s251_s1] sm:$0xf]  ;;  %v32_v7 = vld [vmem:[#allocation2 + $0x10] sm:$0xff]  ;;  %v31_v8 = vld [vmem:[#allocation2 + $0x8] sm:$0xff]  ;;  %s217_s1 = smov [#allocation5]  }
  0x11   :  { %144 = vmatprep.subr.mxu0 %v214_v0  ;;  %40 = vperm.xlu0 %166, %v37_v5   ;;  %v30_v9 = vld [vmem:[#allocation2] sm:$0xff]  ;;  %s124_s22 = sshll.u32 %s217_s1, 4  ;;  %s125_s22 = int_to_ptr.vmem [resolvable:$true] %s124_s22 }
  0x12   :  { %145 = vmatpush3.msra.mxu0 %v35_v3  ;;  %v29_v10 = vld [vmem:[%s250_s0] sm:$0xf]  ;;  %s187_s23 = scalar_lea.vmem %s125_s22, 64  ;;  %p192_p6 = scmp.lt.s32.totalorder %s125_s22, %s125_s22 }
  0x13   :  { %146 = vmatprep.subr.mxu0 %v214_v0  ;;  %p188_p5 = scmp.ne.s32.totalorder %s125_s22, %s187_s23  ;;  %p193_p7 = scmp.lt.s32.totalorder %s187_s23, %s187_s23 }
  0x14   :  { %147 = vmatpush3.msra.mxu0 %v34_v4 }
  0x15   :  { %148 = vmatprep.subr.mxu0 %v214_v0  ;;  %p194_p8 = por %p193_p7, %p192_p6 }
  0x16   :  { %149 = vmatpush3.msra.mxu0 %v33_v6 }
  0x17   :  { %150 = vmatprep.subr.mxu0 %v214_v0  ;;  %p195_p9 = pnand %p194_p8, %p188_p5 }
  0x18   :  { %151 = vmatpush3.msra.mxu0 %v32_v7 }
  0x19   :  { %152 = vmatprep.subr.mxu0 %v214_v0 }
  0x1a   :  { %153 = vmatpush3.msra.mxu0 %v31_v8 }
  0x1b   :  { %154 = vmatprep.subr.mxu0 %v214_v0 }
  0x1c   :  { %155 = vmatpush3.msra.mxu0 %v30_v9 }
  0x1d   :  { %157 = vmatmul.mubr.msk.f32.vlgmr.msra.gmra.mxu0 %vm43_vm1, %v29_v10 }
  0x8c   :  { %v41_v11 = vpop.permute.xlu0 %40 }
  0xdd   :  { %v113_v12 = vpop.f32.mrf.mxu0 }
  0xde   :  { %v114_v13 = vadd.f32 %v113_v12, %v41_v11 }
  0xdf   :  { %v158_v14 = vpop.f32.mrf.mxu0 }
  0xe0   :  { %117 = vst [vmem:[#allocation5] sm:$0xf] %v114_v13 }
  0xe1   :  { %198 = shalt.err (!%p195_p9)
}
  0xe2   :  { %127 = dma.vmem_to_hbm [thread:$0]  %s125_s22, 64, %s253_s3, [#allocation4]  }
  0xe3   :  { %209 = dma.done.wait [#allocation4], 64  }
  0xe4   :  { %210 = vsyncadd [#allocation4], 4294967232 }
  0xe5   :  { %131 = vsyncpa [#allocation3], 1 }
  0xe6   :  { %132 = vsyncpa [#allocation4], 1 }

</bundles_post_ra>
